<compile_context>
chip_gen: v6e
topology: v6e:2x2x1
jax: 0.10.0
libtpu: 0.0.40
codegen_flags: <defaults>
</compile_context>

<pallas_src>
import jax
import jax.numpy as jnp
from jax.experimental import pallas as pl
from jax.experimental.pallas import tpu as pltpu

LANE = 128


def _round_up(v, m):
    return ((v + m - 1) // m) * m


def critic_kernel(x_ref, w1_ref, b1_ref, w2t_ref, b2_ref, o_ref):
    # obs_net: Linear + ReLU.  x arrives in its HBM dtype (f32 here); the bf16
    # cast for the MXU is done in-kernel on the VPU (no extra HBM pass),
    # accumulation stays f32.
    x = x_ref[...].astype(jnp.bfloat16)
    h = jnp.dot(x, w1_ref[...], preferred_element_type=jnp.float32)   # (TM, OP)
    h = jnp.maximum(h + b1_ref[...], 0.0)                             # VPU
    # final_layer: Linear(o_dim, 1).  Contract the hidden axis against the
    # transposed rhs (same dot pattern as q @ k.T) so the result lands as a
    # (1, TM) row: batch on the lane axis -> lane-dense, unmasked stores.
    v = jax.lax.dot_general(
        w2t_ref[...], h,
        dimension_numbers=(((1,), (1,)), ((), ())),
        preferred_element_type=jnp.float32)                           # (1, TM)
    o_ref[...] = (v + b2_ref[0, 0]).astype(o_ref.dtype)               # scalar bias (SMEM)


def prepare_critic_params(w1, b1, w2, b2):
    """One-time parameter prep (call at init, NOT per forward): pad the hidden
    dim to a 128-lane multiple (padding contributes exactly 0) and cast W1 to
    bf16, so the per-step wrapper does no padding / casting / HBM round-trips."""
    d_in, o_dim = w1.shape
    op = _round_up(o_dim, LANE)
    w1_p = jnp.zeros((d_in, op), jnp.float32).at[:, :o_dim].set(w1)
    b1_p = jnp.zeros((1, op), jnp.float32).at[:, :o_dim].set(jnp.reshape(b1, (1, o_dim)))
    w2t_p = jnp.zeros((1, op), jnp.float32).at[:, :o_dim].set(jnp.reshape(w2, (1, o_dim)))
    b2_s = jnp.reshape(b2, (1, 1)).astype(jnp.float32)
    return w1_p.astype(jnp.bfloat16), b1_p, w2t_p, b2_s


def _pick_tm(batch, d_in, op, x_bytes, tm_max, vmem_budget=24 << 20):
    """Batch-tile rows.  Small batches: one full-extent block (legal regardless
    of (8,128) divisibility).  Larger batches: a 128-multiple tile sized so
    (a) the double-buffered x tile + resident weights fit the VMEM budget and
    (b) the grid has >= 2 steps so v7x's second TensorCore gets work."""
    if batch <= LANE:
        return batch
    resident = 2 * d_in * op * 2 + 4 * op * 4           # W1 (bf16, 2 bufs) + b1/w2t
    tm_vmem = max((vmem_budget - resident) // (2 * d_in * x_bytes), LANE)
    tm = min(tm_max, tm_vmem, LANE * pl.cdiv(pl.cdiv(batch, 2), LANE))
    return max(LANE, LANE * (tm // LANE))


def simple_nethack_critic(x_flat, w1_bf, b1_p, w2t_p, b2_s, *, tm_max=1024):
    """x_flat: (B, D_in) f32 (or bf16); remaining args from
    prepare_critic_params.  Returns v_s: (B, 1) f32."""
    B, D_in = x_flat.shape
    OP = w1_bf.shape[1]
    x_bytes = x_flat.dtype.itemsize

    TM = _pick_tm(B, D_in, OP, x_bytes, tm_max)
    grid = (pl.cdiv(B, TM),)

    # Scoped-VMEM limit: actual need + headroom, clamped so it stays inside
    # every generation's physical budget (v7x: 64 MiB physical / 32 default).
    need = (2 * TM * D_in * x_bytes          # x tile, double-buffered
            + 2 * D_in * OP * 2              # W1 (constant index -> DMA'd once)
            + 4 * OP * 4                     # b1 + w2t
            + 2 * 8 * TM * 4)                # (1, TM) out block, sublane-padded
    vmem_limit = int(min(max(need + (4 << 20), 16 << 20), 40 << 20))

    cost = pl.CostEstimate(
        flops=2 * B * D_in * OP + 4 * B * OP,
        transcendentals=0,
        bytes_accessed=(B * D_in * x_bytes   # x, read once in its HBM dtype
                        + D_in * OP * 2      # W1 bf16
                        + 2 * OP * 4 + 4     # b1, w2t, b2
                        + B * 4),            # lane-dense (1, B) output
    )

    out = pl.pallas_call(
        critic_kernel,
        out_shape=jax.ShapeDtypeStruct((1, B), jnp.float32),
        grid=grid,
        in_specs=[
            pl.BlockSpec((TM, D_in), lambda i: (i, 0)),          # x tile
            # Constant-index blocks: DMA'd once, VMEM-resident across the grid.
            pl.BlockSpec((D_in, OP), lambda i: (0, 0)),          # W1 (bf16)
            pl.BlockSpec((1, OP), lambda i: (0, 0)),             # b1
            pl.BlockSpec((1, OP), lambda i: (0, 0)),             # w2^T
            pl.BlockSpec(memory_space=pltpu.MemorySpace.SMEM),   # b2 scalar
        ],
        out_specs=pl.BlockSpec((1, TM), lambda i: (0, i)),       # lane-dense out
        compiler_params=pltpu.CompilerParams(
            dimension_semantics=("parallel",),
            vmem_limit_bytes=vmem_limit),
        cost_estimate=cost,
    )(x_flat, w1_bf, b1_p, w2t_p, b2_s)

    return out.reshape(B, 1)   # (1, B) -> (B, 1): same linear order, free


if __name__ == "__main__":
    # Small shapes consistent with the module: batch=2, obs = 4x16x16 NCHW,
    # obs_net.o_dim = 32, value head -> 1.
    B, C, H, W = 2, 4, 16, 16
    D_IN = C * H * W
    O_DIM = 32

    key = jax.random.PRNGKey(0)
    k_obs, k_w1, k_b1, k_w2, k_b2 = jax.random.split(key, 5)

    obs = jax.random.normal(k_obs, (B, C, H, W), dtype=jnp.float32)

    # Deterministic parameter init (uniform, PyTorch-Linear-style scaling).
    w1 = jax.random.uniform(k_w1, (D_IN, O_DIM), jnp.float32,
                            -1.0 / jnp.sqrt(D_IN), 1.0 / jnp.sqrt(D_IN))
    b1 = jax.random.uniform(k_b1, (1, O_DIM), jnp.float32,
                            -1.0 / jnp.sqrt(D_IN), 1.0 / jnp.sqrt(D_IN))
    w2 = jax.random.uniform(k_w2, (O_DIM, 1), jnp.float32,
                            -1.0 / jnp.sqrt(O_DIM), 1.0 / jnp.sqrt(O_DIM))
    b2 = jax.random.uniform(k_b2, (1, 1), jnp.float32,
                            -1.0 / jnp.sqrt(O_DIM), 1.0 / jnp.sqrt(O_DIM))

    # One-time parameter prep (hoisted out of the forward path per review).
    params = prepare_critic_params(w1, b1, w2, b2)

    # Glue: flatten NCHW row-major, same as torch.flatten(obs, 1).
    x_flat = obs.reshape(B, D_IN)

    v_s = simple_nethack_critic(x_flat, *params)
    jax.block_until_ready(v_s)

    # Pure-JAX reference (x / W1 rounded to bf16 like the kernel's MXU inputs,
    # accumulation in f32).
    x32 = x_flat.astype(jnp.bfloat16).astype(jnp.float32)
    w1_32 = w1.astype(jnp.bfloat16).astype(jnp.float32)
    ref = jnp.maximum(x32 @ w1_32 + b1, 0.0) @ w2 + b2

    assert v_s.shape == (B, 1)
    assert jnp.allclose(v_s, ref, atol=2e-3, rtol=2e-3)

    print("KERNEL_OK")
</pallas_src>

<mosaic_0001>
module attributes {stable_mosaic.version = 11 : i64} {
  func.func @critic_kernel(%arg0: i32, %arg1: memref<2x1024xf32, #tpu.memory_space<vmem>>, %arg2: memref<1024x128xbf16, #tpu.memory_space<vmem>>, %arg3: memref<1x128xf32, #tpu.memory_space<vmem>>, %arg4: memref<1x128xf32, #tpu.memory_space<vmem>>, %arg5: memref<1x1xf32, #tpu.memory_space<smem>>, %arg6: memref<1x2xf32, #tpu.memory_space<vmem>>) attributes {dimension_semantics = [#tpu.dimension_semantics<parallel>], iteration_bounds = array<i64: 1>, scalar_prefetch = 0 : i64, scratch_operands = 0 : i64, tpu.core_type = #tpu.core_type<tc>, window_params = [{transform_indices = @transform_0, window_bounds = array<i64: 2, 1024>}, {pipeline_mode = #tpu.pipeline_mode<synchronous>, transform_indices = @transform_1, window_bounds = array<i64: 1024, 128>}, {pipeline_mode = #tpu.pipeline_mode<synchronous>, transform_indices = @transform_2, window_bounds = array<i64: 1, 128>}, {pipeline_mode = #tpu.pipeline_mode<synchronous>, transform_indices = @transform_3, window_bounds = array<i64: 1, 128>}, {transform_indices = @transform_4, window_bounds = array<i64: 1, 1>}, {transform_indices = @transform_5, window_bounds = array<i64: 1, 2>}]} {
    %c0 = arith.constant 0 : index
    %c0_0 = arith.constant 0 : index
    %0 = vector.load %arg1[%c0, %c0_0] : memref<2x1024xf32, #tpu.memory_space<vmem>>, vector<2x1024xf32>
    %1 = arith.truncf %0 : vector<2x1024xf32> to vector<2x1024xbf16>
    %c0_1 = arith.constant 0 : index
    %c0_2 = arith.constant 0 : index
    %2 = vector.load %arg2[%c0_1, %c0_2] : memref<1024x128xbf16, #tpu.memory_space<vmem>>, vector<1024x128xbf16>
    %cst = arith.constant dense<0.000000e+00> : vector<2x128xf32>
    %3 = tpu.matmul %1, %2, %cst {dimension_numbers = #tpu.dot_dimension_numbers<[1], [0], [0], [1], [0, 0, 1, 1], [], []>} : vector<2x1024xbf16>, vector<1024x128xbf16>, vector<2x128xf32> -> vector<2x128xf32>
    %c0_3 = arith.constant 0 : index
    %c0_4 = arith.constant 0 : index
    %4 = vector.load %arg3[%c0_3, %c0_4] : memref<1x128xf32, #tpu.memory_space<vmem>>, vector<1x128xf32>
    %5 = vector.broadcast %4 : vector<1x128xf32> to vector<2x128xf32>
    %6 = arith.addf %3, %5 : vector<2x128xf32>
    %cst_5 = arith.constant 0.000000e+00 : f32
    %7 = vector.broadcast %cst_5 : f32 to vector<2x128xf32>
    %8 = arith.maximumf %6, %7 : vector<2x128xf32>
    %c0_6 = arith.constant 0 : index
    %c0_7 = arith.constant 0 : index
    %9 = vector.load %arg4[%c0_6, %c0_7] : memref<1x128xf32, #tpu.memory_space<vmem>>, vector<1x128xf32>
    %cst_8 = arith.constant dense<0.000000e+00> : vector<1x2xf32>
    %10 = tpu.matmul %9, %8, %cst_8 {dimension_numbers = #tpu.dot_dimension_numbers<[1], [1], [0], [0], [0, 0, 1, 0], [], []>} : vector<1x128xf32>, vector<2x128xf32>, vector<1x2xf32> -> vector<1x2xf32>
    %c0_9 = arith.constant 0 : index
    %c0_10 = arith.constant 0 : index
    %11 = memref.load %arg5[%c0_9, %c0_10] : memref<1x1xf32, #tpu.memory_space<smem>>
    %12 = vector.broadcast %11 : f32 to vector<1x2xf32>
    %13 = arith.addf %10, %12 : vector<1x2xf32>
    %c0_11 = arith.constant 0 : index
    %c0_12 = arith.constant 0 : index
    %14 = vector.load %arg6[%c0_11, %c0_12] : memref<1x2xf32, #tpu.memory_space<vmem>>, vector<1x2xf32>
    tpu.vector_store %arg6[%c0_11, %c0_12], %13 {strides = array<i32>} : memref<1x2xf32, #tpu.memory_space<vmem>>, vector<1x2xf32>,
    return
  }
  func.func @transform_0(%arg0: i32) -> (i32, i32) {
    %c0_i32 = arith.constant 0 : i32
    %c0_i32_0 = arith.constant 0 : i32
    return %arg0, %c0_i32 : i32, i32
  }
  func.func @transform_1(%arg0: i32) -> (i32, i32) {
    %c0_i32 = arith.constant 0 : i32
    %c0_i32_0 = arith.constant 0 : i32
    %c0_i32_1 = arith.constant 0 : i32
    return %c0_i32, %c0_i32_0 : i32, i32
  }
  func.func @transform_2(%arg0: i32) -> (i32, i32) {
    %c0_i32 = arith.constant 0 : i32
    %c0_i32_0 = arith.constant 0 : i32
    %c0_i32_1 = arith.constant 0 : i32
    return %c0_i32, %c0_i32_0 : i32, i32
  }
  func.func @transform_3(%arg0: i32) -> (i32, i32) {
    %c0_i32 = arith.constant 0 : i32
    %c0_i32_0 = arith.constant 0 : i32
    %c0_i32_1 = arith.constant 0 : i32
    return %c0_i32, %c0_i32_0 : i32, i32
  }
  func.func @transform_4(%arg0: i32) -> (i32, i32) {
    %c0_i32 = arith.constant 0 : i32
    %c0_i32_0 = arith.constant 0 : i32
    %c0_i32_1 = arith.constant 0 : i32
    return %c0_i32, %c0_i32_0 : i32, i32
  }
  func.func @transform_5(%arg0: i32) -> (i32, i32) {
    %c0_i32 = arith.constant 0 : i32
    %c0_i32_0 = arith.constant 0 : i32
    return %c0_i32, %arg0 : i32, i32
  }
}

</mosaic_0001>

<bundles_post_ra>
// kernel: tpu_custom_call.1
= control target key start
LH: loop header
LB: loop body
LE: loop exit
PB: predicated region body
PF: predicated region fallthrough
CT: control target
= control target key end

     0   :  { %11 = vsyncpa [#allocation4], 0  ;;  %s1236_s0 = inlined_call_operand.hbm [shape: f32[2,1024], index: 0, kind: input, shape index: {}]   ;;  %s1237_s1 = inlined_call_operand.hbm [shape: bf16[1024,128], index: 1, kind: input, shape index: {}]   ;;  %s1238_s2 = inlined_call_operand.vmem [shape: f32[1,128], index: 2, kind: input, shape index: {}]   ;;  %s1239_s3 = inlined_call_operand.vmem [shape: f32[1,128], index: 3, kind: input, shape index: {}]   ;;  %s1240_s4 = inlined_call_operand.<no memory space> [shape: f32[1,1], index: 4, kind: input, shape index: {}]   ;;  %s1241_s5 = inlined_call_operand.hbm [shape: f32[1,2], index: 5, kind: output, shape index: {}]  }
   0x1   :  { %12 = vsyncpa [#allocation7], 0 }
   0x2   :  { %13 = vsyncpa [#allocation5], 0  ;;  %s1174_s18 = smov [#allocation3]   ;;  %s1175_s20 = smov [#allocation6]  }
   0x3   :  { %s20_s19 = sshll.u32 %s1174_s18, 4  ;;  %s29_s21 = sshll.u32 %s1175_s20, 4  ;;  %s21_s19 = int_to_ptr.vmem [resolvable:$true] %s20_s19  ;;  %s30_s21 = int_to_ptr.vmem [resolvable:$true] %s29_s21 }
   0x4   :  { %s1116_s22 = scalar_lea.vmem %s21_s19, 256  ;;  %p1121_p1 = scmp.lt.s32.totalorder %s21_s19, %s21_s19 }
   0x5   :  { %p1117_p0 = scmp.ne.s32.totalorder %s21_s19, %s1116_s22  ;;  %p1122_p2 = scmp.lt.s32.totalorder %s1116_s22, %s1116_s22 }
   0x7   :  { %p1123_p3 = por %p1122_p2, %p1121_p1 }
   0x9   :  { %p1124_p4 = pnand %p1123_p3, %p1117_p0 }
   0xb   :  { %1127 = shalt.err (!%p1124_p4)
}
   0xc   :  { %23 = dma.hbm_to_vmem [thread:$0]  %s1236_s0, 256, %s21_s19, [#allocation4]  }
   0xd   :  { %s1136_s25 = scalar_lea.vmem %s30_s21, 8192  ;;  %p1141_p6 = scmp.lt.s32.totalorder %s30_s21, %s30_s21 }
   0xe   :  { %p1137_p5 = scmp.ne.s32.totalorder %s30_s21, %s1136_s25  ;;  %p1142_p7 = scmp.lt.s32.totalorder %s1136_s25, %s1136_s25 }
  0x10   :  { %p1143_p8 = por %p1142_p7, %p1141_p6 }
  0x12   :  { %p1144_p9 = pnand %p1143_p8, %p1137_p5 }
  0x14   :  { %1147 = shalt.err (!%p1144_p9)
}
  0x15   :  { %s1176_s26 = smov 64   ;;  %s1177_s27 = smov 4  }
  0x16   :  { %35 = dma.hbm_to_vmem [thread:$0]  %s1237_s1, 8192, %s30_s21, [#allocation7], %s1176_s26, %s1176_s26, %s1177_s27  }
  0x17   :  { %1168 = dma.done.wait [#allocation4], 256  }
  0x18   :  { %1169 = vsyncadd [#allocation4], 4294967040 }
  0x19   :  { %1170 = dma.done.wait [#allocation7], 8192  }
  0x1a   :  { %1171 = vsyncadd [#allocation7], 4294959104  ;;  %v1042_v0 = vld [vmem:[#allocation6 + $0x78] sm:$0xff]   ;;  %v1046_v4 = vld [vmem:[#allocation6 + $0x70] sm:$0xff]   ;;  %v1178_v22 = vmov 1983009808   ;;  %v57_v24 = vlaneseq }
  0x1b   :  { %v1043_v1 = vld [vmem:[#allocation6 + $0xf8] sm:$0xff]   ;;  %939 = vmatprep.subr.bf16.mxu0 %v1042_v0  ;;  %v1047_v5 = vld [vmem:[#allocation6 + $0xf0] sm:$0xff]   ;;  %v1050_v8 = vld [vmem:[#allocation6 + $0x68] sm:$0xff]   ;;  %v55_v23 = vunpack.c.l.s4 %v1178_v22  ;;  %vm1180_vm0 = vmmov 0   ;;  %s1181_s8 = smov [#allocation8]   ;;  %vm856_vm1 = vcmask 8192  }
  0x1c   :  { %v1044_v2 = vld [vmem:[#allocation6 + $0x38] sm:$0xff]   ;;  %961 = vmatprep.subr.bf16.mxu1 %v1043_v1  ;;  %v1048_v6 = vld [vmem:[#allocation6 + $0x30] sm:$0xff]   ;;  %v1051_v9 = vld [vmem:[#allocation6 + $0xe8] sm:$0xff]   ;;  %v58_v30 = vshrl.u32 %v57_v24, 7  ;;  %s864_s9 = sshll.u32 %s1181_s8, 4  ;;  %s865_s9 = int_to_ptr.vmem [resolvable:$true] %s864_s9 }
  0x1d   :  { %v1045_v3 = vld [vmem:[#allocation6 + $0xb8] sm:$0xff]   ;;  %940 = vmatpush3.bf16.msra.mxu0 %v1044_v2  ;;  %v1049_v7 = vld [vmem:[#allocation6 + $0xb0] sm:$0xff]   ;;  %v1052_v10 = vld [vmem:[#allocation6 + $0x28] sm:$0xff]   ;;  %v56_v29 = vunpack.c.0.s8 %v55_v23  ;;  %s1148_s10 = scalar_lea.vmem %s865_s9, 16  ;;  %s1152_s11 = scalar_lea.vmem %s865_s9, 32 }
  0x1e   :  { %962 = vmatpush3.bf16.msra.mxu1 %v1045_v3  ;;  %941 = vmatprep.subr.bf16.mxu0 %v1046_v4  ;;  %v1053_v11 = vld [vmem:[#allocation6 + $0xa8] sm:$0xff]   ;;  %v1054_v12 = vld [vmem:[#allocation6 + $0x60] sm:$0xff]   ;;  %v1058_v16 = vld [vmem:[#allocation6 + $0x58] sm:$0xff]   ;;  %p1149_p10 = scmp.ne.s32.totalorder %s865_s9, %s1148_s10  ;;  %p1153_p11 = scmp.lt.s32.totalorder %s865_s9, %s865_s9 }
  0x1f   :  { %963 = vmatprep.subr.bf16.mxu1 %v1047_v5  ;;  %v1055_v13 = vld [vmem:[#allocation6 + $0xe0] sm:$0xff]   ;;  %v1059_v17 = vld [vmem:[#allocation6 + $0xd8] sm:$0xff]   ;;  %v1062_v20 = vld [vmem:[#allocation6 + $0x50] sm:$0xff]   ;;  %v1218_v35 = vsub.s32 %v56_v29, %v58_v30  ;;  %p1154_p12 = scmp.lt.s32.totalorder %s1152_s11, %s1148_s10 }
  0x20   :  { %v1056_v14 = vld [vmem:[#allocation6 + $0x20] sm:$0xff]   ;;  %v1060_v18 = vld [vmem:[#allocation6 + $0x18] sm:$0xff]   ;;  %v1063_v21 = vld [vmem:[#allocation6 + $0xd0] sm:$0xff]  }
  0x21   :  { %942 = vmatpush3.bf16.msra.mxu0 %v1048_v6  ;;  %v1057_v15 = vld [vmem:[#allocation6 + $0xa0] sm:$0xff]   ;;  %v1061_v19 = vld [vmem:[#allocation6 + $0x98] sm:$0xff]   ;;  %v1064_v25 = vld [vmem:[#allocation6 + $0x10] sm:$0xff]   ;;  %p1155_p13 = por %p1154_p12, %p1153_p11 }
  0x22   :  { %964 = vmatpush3.bf16.msra.mxu1 %v1049_v7  ;;  %943 = vmatprep.subr.bf16.mxu0 %v1050_v8  ;;  %v1065_v26 = vld [vmem:[#allocation6 + $0x90] sm:$0xff]   ;;  %v1066_v27 = vld [vmem:[#allocation6 + $0x48] sm:$0xff]   ;;  %v1070_v33 = vld [vmem:[#allocation6 + $0x40] sm:$0xff]  }
  0x23   :  { %965 = vmatprep.subr.bf16.mxu1 %v1051_v9  ;;  %v1067_v28 = vld [vmem:[#allocation6 + $0xc8] sm:$0xff]   ;;  %v1071_v34 = vld [vmem:[#allocation6 + $0xc0] sm:$0xff]   ;;  %v49_v38 = vld [vmem:[#allocation3] sm:$0xff]  ;;  %p1156_p0 = pnand %p1155_p13, %p1149_p10 }
  0x24   :  { %v1068_v31 = vld [vmem:[#allocation6 + $0x8] sm:$0xff]   ;;  %v1072_v36 = vld [vmem:[#allocation6] sm:$0xff]   ;;  %v60_v39 = vrot.slane %v49_v38, %v1218_v35  ;;  %v53_v40 = vcombine.high %v49_v38, %v49_v38  ;;  %v1075_v41 = vld [vmem:[#allocation6 + $0x178] sm:$0xff]  }
  0x25   :  { %944 = vmatpush3.bf16.msra.mxu0 %v1052_v10  ;;  %v1069_v32 = vld [vmem:[#allocation6 + $0x88] sm:$0xff]   ;;  %v1073_v37 = vld [vmem:[#allocation6 + $0x80] sm:$0xff]   ;;  %v1076_v42 = vld [vmem:[#allocation6 + $0x1f8] sm:$0xff]  }
  0x26   :  { %966 = vmatpush3.bf16.msra.mxu1 %v1053_v11  ;;  %945 = vmatprep.subr.bf16.mxu0 %v1054_v12  ;;  %v68_v43 = vcombine.high %v60_v39, %v60_v39  ;;  %v67_v44 = vrot.slane %v53_v40, %v1218_v35  ;;  %v95_v45 = vpack.c.bf16 %v60_v39, %v60_v39  ;;  %v1077_v48 = vld [vmem:[#allocation6 + $0x138] sm:$0xff]   ;;  %v1079_v50 = vld [vmem:[#allocation6 + $0x170] sm:$0xff]   ;;  %v1083_v55 = vld [vmem:[#allocation6 + $0x168] sm:$0xff]  }
  0x27   :  { %967 = vmatprep.subr.bf16.mxu1 %v1055_v13  ;;  %v1078_v52 = vld [vmem:[#allocation6 + $0x1b8] sm:$0xff]   ;;  %v1080_v53 = vld [vmem:[#allocation6 + $0x1f0] sm:$0xff]   ;;  %v1084_v57 = vld [vmem:[#allocation6 + $0x1e8] sm:$0xff]  }
  0x28   :  { %v96_v46 = vpack.c.bf16 %v68_v43, %v68_v43  ;;  %v69_v47 = vcombine.high %v67_v44, %v67_v44  ;;  %v97_v49 = vpack.c.bf16 %v67_v44, %v67_v44  ;;  %v1081_v54 = vld [vmem:[#allocation6 + $0x130] sm:$0xff]   ;;  %v1085_v58 = vld [vmem:[#allocation6 + $0x128] sm:$0xff]   ;;  %v1087_v59 = vld [vmem:[#allocation6 + $0x160] sm:$0xff]  }
  0x29   :  { %946 = vmatpush3.bf16.msra.mxu0 %v1056_v14  ;;  %v1082_v56 = vld [vmem:[#allocation6 + $0x1b0] sm:$0xff]   ;;  %v1086_v60 = vld [vmem:[#allocation6 + $0x1a8] sm:$0xff]   ;;  %v1088_v61 = vld [vmem:[#allocation6 + $0x1e0] sm:$0xff]  }
  0x2a   :  { %968 = vmatpush3.bf16.msra.mxu1 %v1057_v15  ;;  %947 = vmatprep.subr.bf16.mxu0 %v1058_v16  ;;  %v98_v51 = vpack.c.bf16 %v69_v47, %v69_v47  ;;  %v1089_v62 = vld [vmem:[#allocation6 + $0x120] sm:$0xff]   ;;  %v1091_v63 = vld [vmem:[#allocation6 + $0x158] sm:$0xff]   ;;  %v1095_v3 = vld [vmem:[#allocation6 + $0x150] sm:$0xff]  }
  0x2b   :  { %969 = vmatprep.subr.bf16.mxu1 %v1059_v17  ;;  %654 = vmatprep.mubr.bf16.mxu0 %v96_v46  ;;  %v1090_v0 = vld [vmem:[#allocation6 + $0x1a0] sm:$0xff]   ;;  %v1092_v1 = vld [vmem:[#allocation6 + $0x1d8] sm:$0xff]   ;;  %v1096_v5 = vld [vmem:[#allocation6 + $0x1d0] sm:$0xff]  }
  0x2c   :  { %694 = vmatprep.mubr.bf16.mxu1 %v98_v51  ;;  %v1093_v2 = vld [vmem:[#allocation6 + $0x118] sm:$0xff]   ;;  %v1097_v6 = vld [vmem:[#allocation6 + $0x110] sm:$0xff]   ;;  %v1099_v7 = vld [vmem:[#allocation6 + $0x148] sm:$0xff]  }
  0x2d   :  { %948 = vmatpush3.bf16.msra.mxu0 %v1060_v18  ;;  %v1094_v4 = vld [vmem:[#allocation6 + $0x198] sm:$0xff]   ;;  %v1098_v8 = vld [vmem:[#allocation6 + $0x190] sm:$0xff]   ;;  %v1100_v9 = vld [vmem:[#allocation6 + $0x1c8] sm:$0xff]  }
  0x2e   :  { %970 = vmatpush3.bf16.msra.mxu1 %v1061_v19  ;;  %949 = vmatprep.subr.bf16.mxu0 %v1062_v20  ;;  %v1101_v10 = vld [vmem:[#allocation6 + $0x108] sm:$0xff]   ;;  %v1103_v11 = vld [vmem:[#allocation6 + $0x140] sm:$0xff]   ;;  %v50_v14 = vld [vmem:[#allocation3 + $0x8] sm:$0xff] }
  0x2f   :  { %971 = vmatprep.subr.bf16.mxu1 %v1063_v21  ;;  %v1102_v12 = vld [vmem:[#allocation6 + $0x188] sm:$0xff]   ;;  %v1104_v13 = vld [vmem:[#allocation6 + $0x1c0] sm:$0xff]   ;;  %v77_v16 = vrot.slane %v50_v14, %v1218_v35  ;;  %v70_v17 = vcombine.high %v50_v14, %v50_v14 }
  0x30   :  { %v1105_v15 = vld [vmem:[#allocation6 + $0x100] sm:$0xff]  }
  0x31   :  { %950 = vmatpush3.bf16.msra.mxu0 %v1064_v25  ;;  %v1106_v18 = vld [vmem:[#allocation6 + $0x180] sm:$0xff]   ;;  %v85_v19 = vcombine.high %v77_v16, %v77_v16  ;;  %v84_v20 = vrot.slane %v70_v17, %v1218_v35  ;;  %v99_v21 = vpack.c.bf16 %v77_v16, %v77_v16 }
  0x32   :  { %972 = vmatpush3.bf16.msra.mxu1 %v1065_v26  ;;  %951 = vmatprep.subr.bf16.mxu0 %v1066_v27  ;;  %v1179_v26 = vmov 0.0  }
  0x33   :  { %973 = vmatprep.subr.bf16.mxu1 %v1067_v28  ;;  %v100_v22 = vpack.c.bf16 %v85_v19, %v85_v19  ;;  %v86_v23 = vcombine.high %v84_v20, %v84_v20  ;;  %v101_v24 = vpack.c.bf16 %v84_v20, %v84_v20 }
  0x35   :  { %952 = vmatpush3.bf16.msra.mxu0 %v1068_v31  ;;  %v102_v25 = vpack.c.bf16 %v86_v23, %v86_v23 }
  0x36   :  { %974 = vmatpush3.bf16.msra.mxu1 %v1069_v32  ;;  %953 = vmatprep.subr.bf16.mxu0 %v1070_v33 }
  0x37   :  { %975 = vmatprep.subr.bf16.mxu1 %v1071_v34 }
  0x39   :  { %954 = vmatpush3.bf16.msra.mxu0 %v1072_v36  ;;  %v874_v36 = vld [vmem:[%s1238_s2] ss:$0 sm:$0xff] }
  0x3a   :  { %976 = vmatpush3.bf16.msra.mxu1 %v1073_v37  ;;  %983 = vmatprep.subr.bf16.mxu0 %v1075_v41 }
  0x3b   :  { %1005 = vmatprep.subr.bf16.mxu1 %v1076_v42 }
  0x3c   :  { %655 = vmatmul.mubr.bf16.vlgmr.msra.gmra.mxu0 %v95_v45 }
  0x3d   :  { %984 = vmatpush3.bf16.msra.mxu0 %v1077_v48  ;;  %695 = vmatmul.mubr.bf16.vlgmr.msra.gmra.mxu1 %v97_v49 }
  0x3e   :  { %985 = vmatprep.subr.bf16.mxu0 %v1079_v50  ;;  %1006 = vmatpush3.bf16.msra.mxu1 %v1078_v52 }
  0x3f   :  { %1007 = vmatprep.subr.bf16.mxu1 %v1080_v53  ;;  %734 = vmatprep.mubr.bf16.mxu0 %v100_v22  ;;  %v783_v53 = vld [vmem:[%s1239_s3] sm:$0x1] }
  0x40   :  { %774 = vmatprep.mubr.bf16.mxu1 %v102_v25 }
  0x41   :  { %986 = vmatpush3.bf16.msra.mxu0 %v1081_v54  ;;  %v785_v54 = vstv %s1240_s4 }
  0x42   :  { %987 = vmatprep.subr.bf16.mxu0 %v1083_v55  ;;  %1008 = vmatpush3.bf16.msra.mxu1 %v1082_v56 }
  0x43   :  { %1009 = vmatprep.subr.bf16.mxu1 %v1084_v57 }
  0x45   :  { %988 = vmatpush3.bf16.msra.mxu0 %v1085_v58 }
  0x46   :  { %989 = vmatprep.subr.bf16.mxu0 %v1087_v59  ;;  %1010 = vmatpush3.bf16.msra.mxu1 %v1086_v60 }
  0x47   :  { %1011 = vmatprep.subr.bf16.mxu1 %v1088_v61 }
  0x49   :  { %990 = vmatpush3.bf16.msra.mxu0 %v1089_v62 }
  0x4a   :  { %991 = vmatprep.subr.bf16.mxu0 %v1091_v63  ;;  %1012 = vmatpush3.bf16.msra.mxu1 %v1090_v0 }
  0x4b   :  { %1013 = vmatprep.subr.bf16.mxu1 %v1092_v1 }
  0x4d   :  { %992 = vmatpush3.bf16.msra.mxu0 %v1093_v2 }
  0x4e   :  { %993 = vmatprep.subr.bf16.mxu0 %v1095_v3  ;;  %1014 = vmatpush3.bf16.msra.mxu1 %v1094_v4 }
  0x4f   :  { %1015 = vmatprep.subr.bf16.mxu1 %v1096_v5 }
  0x51   :  { %994 = vmatpush3.bf16.msra.mxu0 %v1097_v6 }
  0x52   :  { %995 = vmatprep.subr.bf16.mxu0 %v1099_v7  ;;  %1016 = vmatpush3.bf16.msra.mxu1 %v1098_v8 }
  0x53   :  { %1017 = vmatprep.subr.bf16.mxu1 %v1100_v9 }
  0x55   :  { %996 = vmatpush3.bf16.msra.mxu0 %v1101_v10 }
  0x56   :  { %997 = vmatprep.subr.bf16.mxu0 %v1103_v11  ;;  %1018 = vmatpush3.bf16.msra.mxu1 %v1102_v12 }
  0x57   :  { %1019 = vmatprep.subr.bf16.mxu1 %v1104_v13 }
  0x59   :  { %998 = vmatpush3.bf16.msra.mxu0 %v1105_v15 }
  0x5a   :  { %1020 = vmatpush3.bf16.msra.mxu1 %v1106_v18  ;;  %1029 = vmatprep.subr.mxu0 %v1179_v26 }
  0x5c   :  { %735 = vmatmul.mubr.bf16.vlgmr.msra.gmra.mxu0 %v99_v21 }
  0x5d   :  { %775 = vmatmul.mubr.bf16.vlgmr.msra.gmra.mxu1 %v101_v24  ;;  %1031 = vmatprep.mubr.msk.f32.mxu0 %vm1180_vm0, %v1179_v26 }
  0xfc   :  { %v955_v27 = vpop.f32.mrf.mxu0 }
  0xfd   :  { %v977_v28 = vpop.f32.mrf.mxu1 }
  0xfe   :  { %v956_v29 = vpop.f32.mrf.mxu0 }
  0xff   :  { %v978_v30 = vpop.f32.mrf.mxu1  ;;  %v957_v35 = vadd.f32 %v956_v29, %v955_v27 }
 0x100   :  { %v958_v31 = vpop.f32.mrf.mxu0  ;;  %v979_v38 = vadd.f32 %v978_v30, %v977_v28 }
 0x101   :  { %v980_v32 = vpop.f32.mrf.mxu1  ;;  %v657_v37 = vadd.f32 %v957_v35, %v874_v36 }
 0x102   :  { %v959_v33 = vpop.f32.mrf.mxu0 }
 0x103   :  { %v981_v34 = vpop.f32.mrf.mxu1  ;;  %v697_v42 = vadd.f32 %v979_v38, %v657_v37 }
 0x11c   :  { %v999_v39 = vpop.f32.mrf.mxu0 }
 0x11d   :  { %v1021_v40 = vpop.f32.mrf.mxu1 }
 0x11e   :  { %v1000_v41 = vpop.f32.mrf.mxu0 }
 0x11f   :  { %v1001_v43 = vadd.f32 %v1000_v41, %v999_v39  ;;  %v1022_v44 = vpop.f32.mrf.mxu1 }
 0x120   :  { %v1002_v45 = vpop.f32.mrf.mxu0  ;;  %v1023_v47 = vadd.f32 %v1022_v44, %v1021_v40 }
 0x121   :  { %v737_v46 = vadd.f32 %v1001_v43, %v697_v42  ;;  %v1024_v48 = vpop.f32.mrf.mxu1 }
 0x122   :  { %v1003_v49 = vpop.f32.mrf.mxu0 }
 0x123   :  { %v777_v50 = vadd.f32 %v1023_v47, %v737_v46  ;;  %v1025_v51 = vpop.f32.mrf.mxu1 }
 0x125   :  { %v782_v52 = vmax.f32 %v777_v50, 0.0 }
 0x127   :  { %1030 = vmatpush3.xpose.msra.mxu0 %v782_v52 }
 0x12a   :  { %1032 = vmatmul.mubr.f32.vlgmr.msra.gmra.mxu0 %v783_v53 }
 0x1ea   :  { %v852_v55 = vpop.f32.mrf.mxu0 }
 0x1eb   :  { %v853_v56 = vadd.f32 %v852_v55, %v785_v54 }
 0x1ec   :  { %v1033_v57 = vpop.f32.mrf.mxu0 }
 0x1ed   :  { %857 = vst.msk [vmem:[#allocation8] sm:$0x1] %vm856_vm1, %v853_v56 }
 0x1ee   :  { %1159 = shalt.err (!%p1156_p0)
}
 0x1ef   :  { %867 = dma.vmem_to_hbm [thread:$0]  %s865_s9, 16, %s1241_s5, [#allocation5]  }
 0x1f0   :  { %1172 = dma.done.wait [#allocation5], 16  }
 0x1f1   :  { %1173 = vsyncadd [#allocation5], 4294967280 }
 0x1f2   :  { %871 = vsyncpa [#allocation4], 1 }
 0x1f3   :  { %872 = vsyncpa [#allocation7], 1 }
 0x1f4   :  { %873 = vsyncpa [#allocation5], 1 }

</bundles_post_ra>
